<compile_context>
chip_gen: v7x
topology: tpu7x:2x2x1
jax: 0.10.0
libtpu: 0.0.40
codegen_flags: <defaults>
</compile_context>

<pallas_src>
import functools
import math

import numpy as np
import jax
import jax.numpy as jnp
from jax import lax
from jax.experimental import pallas as pl
from jax.experimental.pallas import tpu as pltpu


# ----------------------------- constants / helpers ---------------------------------

def _i32(v):
    """Python int -> np.int32 with two's-complement wrapping (for bit constants)."""
    v = int(v) & 0xFFFFFFFF
    if v >= 1 << 31:
        v -= 1 << 32
    return np.int32(v)


_EXP_MASK = _i32(0xFF800000)    # sign + 8 exponent bits
_FRAC_MASK = _i32(0x007FFFFF)   # 23 fraction bits
_ABS_MASK = _i32(0x7FFFFFFF)    # clears the sign bit

_HASH_M1 = _i32(0x7FEB352D)     # lowbias32 multipliers (Chris Wellons)
_HASH_M2 = _i32(0x846CA68B)
_SEED_C0 = _i32(0x85EBCA6B)
_SEED_C1 = _i32(0xC2B2AE35)
_DRAW_C = tuple(_i32((k * 0x9E3779B9 + 0x6A09E667) & 0xFFFFFFFF) for k in range(1, 129))

_LANE_CHOICES = (512, 256, 128)  # lane-dense last dims (multiples of 128)
_MAX_TM = 1024                   # max rows per tile -> 1024*512*4B = 2 MiB per fp32 tile


def find_nearest_prob_n_halves(prob):
    """Find integer n such that 0.5**n is nearest to `prob` (None passes through)."""
    if prob is None:
        return None
    assert 0.0 < prob < 1.0
    best_n, best_err = 1, float("inf")
    for n in range(1, 64):
        err = abs(0.5 ** n - prob)
        if err < best_err:
            best_err, best_n = err, n
    return best_n


def calculate_flip_probability(n_halves):
    return None if n_halves is None else 0.5 ** n_halves


def _format_prob(prob):
    return "None" if prob is None else f"{prob:.2e}"


# --------------------------------- Pallas kernel -----------------------------------

def _srl(x, n):
    """Logical right shift on int32 (arithmetic shift + mask of sign-extended bits)."""
    return (x >> n) & _i32((1 << (32 - n)) - 1)


def _hash_i32(x):
    """lowbias32 integer hash: good avalanche, cheap on the VPU, int32 in/out."""
    x = x ^ _srl(x, 16)
    x = x * _HASH_M1
    x = x ^ _srl(x, 15)
    x = x * _HASH_M2
    x = x ^ _srl(x, 16)
    return x


def _make_bitflip_kernel(exp_halves, frac_halves, zero_out_t, use_hw_prng):
    e = int(exp_halves or 0)
    f = int(frac_halves or 0)
    n_common = min(e, f)               # full-width words shared by both masks
    exp_rem = e - n_common             # extra depths needed only in the 9 exp bits
    frac_rem = f - n_common            # extra depths needed only in the 23 frac bits
    n_words = n_common + (exp_rem + 2) // 3 + frac_rem

    if zero_out_t is not None:
        assert zero_out_t > 0 and math.isfinite(zero_out_t), \
            "zero_out_threshold must be a finite positive float"
        thresh_bits = _i32(int(np.asarray(zero_out_t, dtype=np.float32).view(np.int32)))

    def kernel(seeds_ref, x_ref, o_ref):
        tm, lane = x_ref.shape
        bits = lax.bitcast_convert_type(x_ref[...], jnp.int32)

        if n_words > 0:
            if use_hw_prng:
                # TPU hardware PRNG: one issue per random word, shortest VPU path.
                pltpu.prng_seed(seeds_ref[0], seeds_ref[1], pl.program_id(0))

                def draw(_k):
                    r = pltpu.prng_random_bits((tm, lane))
                    if r.dtype != jnp.int32:
                        r = pltpu.bitcast(r, jnp.int32)
                    return r
            else:
                # Counter-based hash PRNG (portable: Mosaic + interpreter).
                # Keyed on (global element index, seed_exp, seed_frac) -> the random
                # pattern is independent of the tiling configuration.
                row = lax.broadcasted_iota(jnp.int32, (tm, lane), 0)
                col = lax.broadcasted_iota(jnp.int32, (tm, lane), 1)
                gid = (pl.program_id(0) * tm + row) * lane + col
                seed_mix = seeds_ref[0] * _SEED_C0 + seeds_ref[1] * _SEED_C1
                base = _hash_i32(gid ^ seed_mix)

                def draw(k):
                    return _hash_i32(base ^ _DRAW_C[k])

            widx = 0
            running = None
            for _ in range(n_common):
                w = draw(widx); widx += 1
                running = w if running is None else running & w

            if e == f:
                # EXP_MASK | FRAC_MASK covers all 32 bits -> no masking needed.
                flip = running
            else:
                flip = None
                if e > 0:
                    exp_acc = running
                    need = exp_rem
                    while need > 0:
                        w = draw(widx); widx += 1
                        for sh in (0, 9, 18):       # three disjoint 9-bit fields / word
                            if need == 0:
                                break
                            piece = w if sh == 0 else (w << sh)
                            exp_acc = piece if exp_acc is None else (exp_acc & piece)
                            need -= 1
                    flip = exp_acc & _EXP_MASK
                if f > 0:
                    frac_acc = running
                    for _ in range(frac_rem):
                        w = draw(widx); widx += 1
                        frac_acc = w if frac_acc is None else (frac_acc & w)
                    term = frac_acc & _FRAC_MASK
                    flip = term if flip is None else (flip | term)

            bits = bits ^ flip

        if zero_out_t is not None:
            # integer-domain |x| < threshold: NaN / Inf / exploded exponents all have
            # abs bit patterns >= the finite threshold pattern and get zeroed.
            keep = (bits & _ABS_MASK) < thresh_bits
            bits = jnp.where(keep, bits, jnp.zeros_like(bits))

        o_ref[...] = lax.bitcast_convert_type(bits, jnp.float32)

    return kernel, n_words


# --------------------------------- wrapper / launch ---------------------------------

def _choose_layout(n):
    """Pick (lane, rows). Exact reshape whenever n is divisible by 128."""
    for lane in _LANE_CHOICES:
        if n % lane == 0:
            return lane, n // lane
    # TODO(synk): ragged sizes (n % 128 != 0) still pad+slice; rare for NN activations.
    lane = 512
    return lane, -(-n // lane)


def _choose_tm(rows):
    """Rows per tile: multiple of 8 (or the full dim), >=2 grid steps when rows>=16."""
    if rows <= 8:
        return max(rows, 1)
    return min(_MAX_TM, ((rows + 15) // 16) * 8)   # ~ceil(rows/2) rounded up to 8


@functools.partial(jax.jit, static_argnames=("exp_halves", "frac_halves",
                                             "zero_out_threshold", "use_hw_prng"))
def _random_bitflip_pallas(x, seeds, *, exp_halves, frac_halves,
                           zero_out_threshold, use_hw_prng):
    assert x.dtype == jnp.float32, "kernel implements the fp32 bit layout"
    # TODO(synk): fp16/bf16 variants need their own sign-exp / fraction bit masks.
    orig_shape = x.shape
    n = x.size
    if n == 0:
        return x

    lane, rows = _choose_layout(n)
    n_grid = rows * lane
    flat = x.reshape(-1)
    if n_grid != n:
        flat = jnp.pad(flat, (0, n_grid - n))
    x2 = flat.reshape(rows, lane)

    tm = _choose_tm(rows)
    grid = (-(-rows // tm),)

    kernel, n_words = _make_bitflip_kernel(exp_halves, frac_halves,
                                           zero_out_threshold, use_hw_prng)
    flops_per_elem = 8 + (4 * n_words if use_hw_prng else 12 * (n_words + 1))
    cost = pl.CostEstimate(flops=flops_per_elem * n_grid,
                           transcendentals=0,
                           bytes_accessed=8 * n_grid)

    out2 = pl.pallas_call(
        kernel,
        out_shape=jax.ShapeDtypeStruct((rows, lane), jnp.float32),
        grid=grid,
        in_specs=[
            pl.BlockSpec(memory_space=pltpu.MemorySpace.SMEM),   # seeds (2,) int32
            pl.BlockSpec((tm, lane), lambda i: (i, 0)),          # x tile
        ],
        out_specs=pl.BlockSpec((tm, lane), lambda i: (i, 0)),
        compiler_params=pltpu.CompilerParams(
            dimension_semantics=("parallel",),
            vmem_limit_bytes=32 * 1024 * 1024),
        cost_estimate=cost,
    )(seeds, x2)

    out = out2.reshape(-1)
    if n_grid != n:
        out = out[:n]
    return out.reshape(orig_shape)


def random_bitflip_fn(x, exp_halves, frac_halves, seed_exp, seed_frac,
                      zero_out_threshold):
    """Functional form matching mase_triton.random_bitflip.random_bitflip_fn."""
    seeds = np.asarray([seed_exp, seed_frac], dtype=np.int32)   # one tiny transfer
    use_hw_prng = jax.default_backend() == "tpu"
    out = _random_bitflip_pallas(
        x, seeds,
        exp_halves=exp_halves,
        frac_halves=frac_halves,
        zero_out_threshold=zero_out_threshold,
        use_hw_prng=use_hw_prng,
    )
    # seeds advance after every call so consecutive calls draw fresh bits
    new_seed_exp = seed_exp + 1 if exp_halves is not None else seed_exp
    new_seed_frac = seed_frac + 1 if frac_halves is not None else seed_frac
    return out, new_seed_exp, new_seed_frac


# --------------------------------- module wrapper -----------------------------------

class RandomBitFlipDropout:
    """JAX/Pallas port of mase_triton's RandomBitFlipDropout (forward only)."""

    def __init__(self, p_exp, p_frac, zero_out_t, seed_exp=0, seed_frac=0):
        self.p_exp = p_exp
        self.p_frac = p_frac
        self.nearest_exp_halves = find_nearest_prob_n_halves(p_exp)
        self.nearest_frac_halves = find_nearest_prob_n_halves(p_frac)
        self.seed_exp = seed_exp
        self.seed_frac = seed_frac
        self.zero_out_t = zero_out_t

    def __call__(self, x):
        if self.p_exp is None and self.p_frac is None and self.zero_out_t is None:
            return x
        out, seed_exp, seed_frac = random_bitflip_fn(
            x,
            exp_halves=self.nearest_exp_halves,
            frac_halves=self.nearest_frac_halves,
            seed_exp=self.seed_exp,
            seed_frac=self.seed_frac,
            zero_out_threshold=self.zero_out_t,
        )
        self.seed_exp = seed_exp
        self.seed_frac = seed_frac
        return out

    def extra_repr(self):
        return (f"nearest_p_exp={_format_prob(calculate_flip_probability(self.nearest_exp_halves))}, "
                f"nearest_p_frac={_format_prob(calculate_flip_probability(self.nearest_frac_halves))}, "
                f"zero_out_threshold={self.zero_out_t}, "
                f"seed_exp={self.seed_exp}, seed_frac={self.seed_frac}")


# -------------------------------------- main ----------------------------------------

if __name__ == "__main__":
    key = jax.random.PRNGKey(0)
    x = jax.random.normal(key, (2, 4, 16, 16), dtype=jnp.float32)  # NCHW, 2048 elems

    layer = RandomBitFlipDropout(
        p_exp=2.0 ** -6,     # sign/exponent bits flip with prob ~1/64 per bit
        p_frac=2.0 ** -2,    # fraction bits flip with prob ~1/4 per bit
        zero_out_t=100.0,    # zero out exploded / NaN elements
        seed_exp=0,
        seed_frac=0,
    )

    out = jax.block_until_ready(layer(x))

    assert out.shape == x.shape and out.dtype == x.dtype
    assert bool(jnp.all(jnp.isfinite(out)))                 # NaN/inf are zeroed out
    assert bool(jnp.all(jnp.abs(out) < 100.0))              # threshold respected
    assert bool(jnp.any(out != x))                          # flips actually happened
    assert layer.seed_exp == 1 and layer.seed_frac == 1     # seeds advanced

    # second call draws different bits (seeds advanced)
    out2 = jax.block_until_ready(layer(x))
    assert out2.shape == x.shape

    print("KERNEL_OK")
</pallas_src>

<mosaic_0001>
module attributes {stable_mosaic.version = 11 : i64} {
  func.func @kernel(%arg0: i32, %arg1: memref<2xi32, #tpu.memory_space<smem>>, %arg2: memref<4x512xf32, #tpu.memory_space<vmem>>, %arg3: memref<4x512xf32, #tpu.memory_space<vmem>>) attributes {dimension_semantics = [#tpu.dimension_semantics<parallel>], iteration_bounds = array<i64: 1>, scalar_prefetch = 0 : i64, scratch_operands = 0 : i64, tpu.core_type = #tpu.core_type<tc>, window_params = [{transform_indices = @transform_0, window_bounds = array<i64: 2>}, {transform_indices = @transform_1, window_bounds = array<i64: 4, 512>}, {transform_indices = @transform_2, window_bounds = array<i64: 4, 512>}]} {
    %c0 = arith.constant 0 : index
    %c0_0 = arith.constant 0 : index
    %0 = vector.load %arg2[%c0, %c0_0] : memref<4x512xf32, #tpu.memory_space<vmem>>, vector<4x512xf32>
    %1 = tpu.bitcast %0 : vector<4x512xf32> -> vector<4x512xi32>
    %2 = tpu.iota {dimensions = array<i32: 0>} : vector<4x512xi32>
    %3 = tpu.iota {dimensions = array<i32: 1>} : vector<4x512xi32>
    %c4_i32 = arith.constant 4 : i32
    %4 = arith.muli %arg0, %c4_i32 : i32
    %5 = vector.broadcast %4 : i32 to vector<4x512xi32>
    %6 = arith.addi %5, %2 : vector<4x512xi32>
    %c512_i32 = arith.constant 512 : i32
    %7 = vector.broadcast %c512_i32 : i32 to vector<4x512xi32>
    %8 = arith.muli %6, %7 : vector<4x512xi32>
    %9 = arith.addi %8, %3 : vector<4x512xi32>
    %c0_1 = arith.constant 0 : index
    %10 = memref.load %arg1[%c0_1] : memref<2xi32, #tpu.memory_space<smem>>
    %c-2048144789_i32 = arith.constant -2048144789 : i32
    %11 = arith.muli %10, %c-2048144789_i32 : i32
    %c1 = arith.constant 1 : index
    %12 = memref.load %arg1[%c1] : memref<2xi32, #tpu.memory_space<smem>>
    %c-1028477387_i32 = arith.constant -1028477387 : i32
    %13 = arith.muli %12, %c-1028477387_i32 : i32
    %14 = arith.addi %11, %13 : i32
    %15 = vector.broadcast %14 : i32 to vector<4x512xi32>
    %16 = arith.xori %9, %15 : vector<4x512xi32>
    %c16_i32 = arith.constant 16 : i32
    %17 = vector.broadcast %c16_i32 : i32 to vector<4x512xi32>
    %18 = arith.shrsi %16, %17 : vector<4x512xi32>
    %c65535_i32 = arith.constant 65535 : i32
    %19 = vector.broadcast %c65535_i32 : i32 to vector<4x512xi32>
    %20 = arith.andi %18, %19 : vector<4x512xi32>
    %21 = arith.xori %16, %20 : vector<4x512xi32>
    %c2146121005_i32 = arith.constant 2146121005 : i32
    %22 = vector.broadcast %c2146121005_i32 : i32 to vector<4x512xi32>
    %23 = arith.muli %21, %22 : vector<4x512xi32>
    %c15_i32 = arith.constant 15 : i32
    %24 = vector.broadcast %c15_i32 : i32 to vector<4x512xi32>
    %25 = arith.shrsi %23, %24 : vector<4x512xi32>
    %c131071_i32 = arith.constant 131071 : i32
    %26 = vector.broadcast %c131071_i32 : i32 to vector<4x512xi32>
    %27 = arith.andi %25, %26 : vector<4x512xi32>
    %28 = arith.xori %23, %27 : vector<4x512xi32>
    %c-2073254261_i32 = arith.constant -2073254261 : i32
    %29 = vector.broadcast %c-2073254261_i32 : i32 to vector<4x512xi32>
    %30 = arith.muli %28, %29 : vector<4x512xi32>
    %c16_i32_2 = arith.constant 16 : i32
    %31 = vector.broadcast %c16_i32_2 : i32 to vector<4x512xi32>
    %32 = arith.shrsi %30, %31 : vector<4x512xi32>
    %c65535_i32_3 = arith.constant 65535 : i32
    %33 = vector.broadcast %c65535_i32_3 : i32 to vector<4x512xi32>
    %34 = arith.andi %32, %33 : vector<4x512xi32>
    %35 = arith.xori %30, %34 : vector<4x512xi32>
    %c138502176_i32 = arith.constant 138502176 : i32
    %36 = vector.broadcast %c138502176_i32 : i32 to vector<4x512xi32>
    %37 = arith.xori %35, %36 : vector<4x512xi32>
    %c16_i32_4 = arith.constant 16 : i32
    %38 = vector.broadcast %c16_i32_4 : i32 to vector<4x512xi32>
    %39 = arith.shrsi %37, %38 : vector<4x512xi32>
    %c65535_i32_5 = arith.constant 65535 : i32
    %40 = vector.broadcast %c65535_i32_5 : i32 to vector<4x512xi32>
    %41 = arith.andi %39, %40 : vector<4x512xi32>
    %42 = arith.xori %37, %41 : vector<4x512xi32>
    %c2146121005_i32_6 = arith.constant 2146121005 : i32
    %43 = vector.broadcast %c2146121005_i32_6 : i32 to vector<4x512xi32>
    %44 = arith.muli %42, %43 : vector<4x512xi32>
    %c15_i32_7 = arith.constant 15 : i32
    %45 = vector.broadcast %c15_i32_7 : i32 to vector<4x512xi32>
    %46 = arith.shrsi %44, %45 : vector<4x512xi32>
    %c131071_i32_8 = arith.constant 131071 : i32
    %47 = vector.broadcast %c131071_i32_8 : i32 to vector<4x512xi32>
    %48 = arith.andi %46, %47 : vector<4x512xi32>
    %49 = arith.xori %44, %48 : vector<4x512xi32>
    %c-2073254261_i32_9 = arith.constant -2073254261 : i32
    %50 = vector.broadcast %c-2073254261_i32_9 : i32 to vector<4x512xi32>
    %51 = arith.muli %49, %50 : vector<4x512xi32>
    %c16_i32_10 = arith.constant 16 : i32
    %52 = vector.broadcast %c16_i32_10 : i32 to vector<4x512xi32>
    %53 = arith.shrsi %51, %52 : vector<4x512xi32>
    %c65535_i32_11 = arith.constant 65535 : i32
    %54 = vector.broadcast %c65535_i32_11 : i32 to vector<4x512xi32>
    %55 = arith.andi %53, %54 : vector<4x512xi32>
    %56 = arith.xori %51, %55 : vector<4x512xi32>
    %c-1502029351_i32 = arith.constant -1502029351 : i32
    %57 = vector.broadcast %c-1502029351_i32 : i32 to vector<4x512xi32>
    %58 = arith.xori %35, %57 : vector<4x512xi32>
    %c16_i32_12 = arith.constant 16 : i32
    %59 = vector.broadcast %c16_i32_12 : i32 to vector<4x512xi32>
    %60 = arith.shrsi %58, %59 : vector<4x512xi32>
    %c65535_i32_13 = arith.constant 65535 : i32
    %61 = vector.broadcast %c65535_i32_13 : i32 to vector<4x512xi32>
    %62 = arith.andi %60, %61 : vector<4x512xi32>
    %63 = arith.xori %58, %62 : vector<4x512xi32>
    %c2146121005_i32_14 = arith.constant 2146121005 : i32
    %64 = vector.broadcast %c2146121005_i32_14 : i32 to vector<4x512xi32>
    %65 = arith.muli %63, %64 : vector<4x512xi32>
    %c15_i32_15 = arith.constant 15 : i32
    %66 = vector.broadcast %c15_i32_15 : i32 to vector<4x512xi32>
    %67 = arith.shrsi %65, %66 : vector<4x512xi32>
    %c131071_i32_16 = arith.constant 131071 : i32
    %68 = vector.broadcast %c131071_i32_16 : i32 to vector<4x512xi32>
    %69 = arith.andi %67, %68 : vector<4x512xi32>
    %70 = arith.xori %65, %69 : vector<4x512xi32>
    %c-2073254261_i32_17 = arith.constant -2073254261 : i32
    %71 = vector.broadcast %c-2073254261_i32_17 : i32 to vector<4x512xi32>
    %72 = arith.muli %70, %71 : vector<4x512xi32>
    %c16_i32_18 = arith.constant 16 : i32
    %73 = vector.broadcast %c16_i32_18 : i32 to vector<4x512xi32>
    %74 = arith.shrsi %72, %73 : vector<4x512xi32>
    %c65535_i32_19 = arith.constant 65535 : i32
    %75 = vector.broadcast %c65535_i32_19 : i32 to vector<4x512xi32>
    %76 = arith.andi %74, %75 : vector<4x512xi32>
    %77 = arith.xori %72, %76 : vector<4x512xi32>
    %78 = arith.andi %56, %77 : vector<4x512xi32>
    %c1152406418_i32 = arith.constant 1152406418 : i32
    %79 = vector.broadcast %c1152406418_i32 : i32 to vector<4x512xi32>
    %80 = arith.xori %35, %79 : vector<4x512xi32>
    %c16_i32_20 = arith.constant 16 : i32
    %81 = vector.broadcast %c16_i32_20 : i32 to vector<4x512xi32>
    %82 = arith.shrsi %80, %81 : vector<4x512xi32>
    %c65535_i32_21 = arith.constant 65535 : i32
    %83 = vector.broadcast %c65535_i32_21 : i32 to vector<4x512xi32>
    %84 = arith.andi %82, %83 : vector<4x512xi32>
    %85 = arith.xori %80, %84 : vector<4x512xi32>
    %c2146121005_i32_22 = arith.constant 2146121005 : i32
    %86 = vector.broadcast %c2146121005_i32_22 : i32 to vector<4x512xi32>
    %87 = arith.muli %85, %86 : vector<4x512xi32>
    %c15_i32_23 = arith.constant 15 : i32
    %88 = vector.broadcast %c15_i32_23 : i32 to vector<4x512xi32>
    %89 = arith.shrsi %87, %88 : vector<4x512xi32>
    %c131071_i32_24 = arith.constant 131071 : i32
    %90 = vector.broadcast %c131071_i32_24 : i32 to vector<4x512xi32>
    %91 = arith.andi %89, %90 : vector<4x512xi32>
    %92 = arith.xori %87, %91 : vector<4x512xi32>
    %c-2073254261_i32_25 = arith.constant -2073254261 : i32
    %93 = vector.broadcast %c-2073254261_i32_25 : i32 to vector<4x512xi32>
    %94 = arith.muli %92, %93 : vector<4x512xi32>
    %c16_i32_26 = arith.constant 16 : i32
    %95 = vector.broadcast %c16_i32_26 : i32 to vector<4x512xi32>
    %96 = arith.shrsi %94, %95 : vector<4x512xi32>
    %c65535_i32_27 = arith.constant 65535 : i32
    %97 = vector.broadcast %c65535_i32_27 : i32 to vector<4x512xi32>
    %98 = arith.andi %96, %97 : vector<4x512xi32>
    %99 = arith.xori %94, %98 : vector<4x512xi32>
    %100 = arith.andi %78, %99 : vector<4x512xi32>
    %c9_i32 = arith.constant 9 : i32
    %101 = vector.broadcast %c9_i32 : i32 to vector<4x512xi32>
    %102 = arith.shli %99, %101 : vector<4x512xi32>
    %103 = arith.andi %100, %102 : vector<4x512xi32>
    %c18_i32 = arith.constant 18 : i32
    %104 = vector.broadcast %c18_i32 : i32 to vector<4x512xi32>
    %105 = arith.shli %99, %104 : vector<4x512xi32>
    %106 = arith.andi %103, %105 : vector<4x512xi32>
    %c-488125109_i32 = arith.constant -488125109 : i32
    %107 = vector.broadcast %c-488125109_i32 : i32 to vector<4x512xi32>
    %108 = arith.xori %35, %107 : vector<4x512xi32>
    %c16_i32_28 = arith.constant 16 : i32
    %109 = vector.broadcast %c16_i32_28 : i32 to vector<4x512xi32>
    %110 = arith.shrsi %108, %109 : vector<4x512xi32>
    %c65535_i32_29 = arith.constant 65535 : i32
    %111 = vector.broadcast %c65535_i32_29 : i32 to vector<4x512xi32>
    %112 = arith.andi %110, %111 : vector<4x512xi32>
    %113 = arith.xori %108, %112 : vector<4x512xi32>
    %c2146121005_i32_30 = arith.constant 2146121005 : i32
    %114 = vector.broadcast %c2146121005_i32_30 : i32 to vector<4x512xi32>
    %115 = arith.muli %113, %114 : vector<4x512xi32>
    %c15_i32_31 = arith.constant 15 : i32
    %116 = vector.broadcast %c15_i32_31 : i32 to vector<4x512xi32>
    %117 = arith.shrsi %115, %116 : vector<4x512xi32>
    %c131071_i32_32 = arith.constant 131071 : i32
    %118 = vector.broadcast %c131071_i32_32 : i32 to vector<4x512xi32>
    %119 = arith.andi %117, %118 : vector<4x512xi32>
    %120 = arith.xori %115, %119 : vector<4x512xi32>
    %c-2073254261_i32_33 = arith.constant -2073254261 : i32
    %121 = vector.broadcast %c-2073254261_i32_33 : i32 to vector<4x512xi32>
    %122 = arith.muli %120, %121 : vector<4x512xi32>
    %c16_i32_34 = arith.constant 16 : i32
    %123 = vector.broadcast %c16_i32_34 : i32 to vector<4x512xi32>
    %124 = arith.shrsi %122, %123 : vector<4x512xi32>
    %c65535_i32_35 = arith.constant 65535 : i32
    %125 = vector.broadcast %c65535_i32_35 : i32 to vector<4x512xi32>
    %126 = arith.andi %124, %125 : vector<4x512xi32>
    %127 = arith.xori %122, %126 : vector<4x512xi32>
    %128 = arith.andi %106, %127 : vector<4x512xi32>
    %c-8388608_i32 = arith.constant -8388608 : i32
    %129 = vector.broadcast %c-8388608_i32 : i32 to vector<4x512xi32>
    %130 = arith.andi %128, %129 : vector<4x512xi32>
    %c8388607_i32 = arith.constant 8388607 : i32
    %131 = vector.broadcast %c8388607_i32 : i32 to vector<4x512xi32>
    %132 = arith.andi %78, %131 : vector<4x512xi32>
    %133 = arith.ori %130, %132 : vector<4x512xi32>
    %134 = arith.xori %1, %133 : vector<4x512xi32>
    %c2147483647_i32 = arith.constant 2147483647 : i32
    %135 = vector.broadcast %c2147483647_i32 : i32 to vector<4x512xi32>
    %136 = arith.andi %134, %135 : vector<4x512xi32>
    %c1120403456_i32 = arith.constant 1120403456 : i32
    %137 = vector.broadcast %c1120403456_i32 : i32 to vector<4x512xi32>
    %138 = arith.cmpi slt, %136, %137 : vector<4x512xi32>
    %c0_i32 = arith.constant 0 : i32
    %139 = vector.broadcast %c0_i32 : i32 to vector<4x512xi32>
    %140 = arith.select %138, %134, %139 : vector<4x512xi1>, vector<4x512xi32>
    %141 = tpu.bitcast %140 : vector<4x512xi32> -> vector<4x512xf32>
    %c0_36 = arith.constant 0 : index
    %c0_37 = arith.constant 0 : index
    %142 = vector.load %arg3[%c0_36, %c0_37] : memref<4x512xf32, #tpu.memory_space<vmem>>, vector<4x512xf32>
    tpu.vector_store %arg3[%c0_36, %c0_37], %141 {strides = array<i32>} : memref<4x512xf32, #tpu.memory_space<vmem>>, vector<4x512xf32>,
    return
  }
  func.func @transform_0(%arg0: i32) -> i32 {
    %c0_i32 = arith.constant 0 : i32
    %c0_i32_0 = arith.constant 0 : i32
    return %c0_i32 : i32
  }
  func.func @transform_1(%arg0: i32) -> (i32, i32) {
    %c0_i32 = arith.constant 0 : i32
    %c0_i32_0 = arith.constant 0 : i32
    return %arg0, %c0_i32 : i32, i32
  }
  func.func @transform_2(%arg0: i32) -> (i32, i32) {
    %c0_i32 = arith.constant 0 : i32
    %c0_i32_0 = arith.constant 0 : i32
    return %arg0, %c0_i32 : i32, i32
  }
}

</mosaic_0001>

<bundles_post_ra>
// kernel: _random_bitflip_pallas.1
= control target key start
LH: loop header
LB: loop body
LE: loop exit
PB: predicated region body
PF: predicated region fallthrough
CT: control target
= control target key end

     0   :  { %7 = vsyncpa [#allocation3], 0  ;;  %s507_s0 = inlined_call_operand.vmem [shape: s32[2], index: 0, kind: input, shape index: {}]   ;;  %s508_s1 = inlined_call_operand.vmem [shape: f32[4,512], index: 1, kind: input, shape index: {}]   ;;  %s509_s2 = inlined_call_operand.vmem [shape: f32[4,512], index: 2, kind: output, shape index: {}]  }
   0x1   :  { %s14_s11 = sshll.u32 %s507_s0, 4  ;;  %s15_s11 = int_to_ptr.vmem [resolvable:$true] %s14_s11 }
   0x2   :  { %s422_s12 = scalar_lea.vmem %s15_s11, 16  ;;  %p427_p1 = scmp.lt.s32.totalorder %s15_s11, %s15_s11 }
   0x3   :  { %p423_p0 = scmp.ne.s32.totalorder %s15_s11, %s422_s12  ;;  %p428_p2 = scmp.lt.s32.totalorder %s422_s12, %s422_s12 }
   0x5   :  { %p429_p3 = por %p428_p2, %p427_p1 }
   0x7   :  { %p430_p4 = pnand %p429_p3, %p423_p0 }
   0x9   :  { %433 = shalt.err (!%p430_p4)
}
   0xa   :  { %s436_s13 = smov [#allocation2]  }
   0xb   :  { %17 = dma.vmem_to_smem %s15_s11, 16, %s436_s13, [#allocation3]  }
   0xc   :  { %434 = dma.done.wait [#allocation3], 16  }
   0xd   :  { %435 = vsyncadd [#allocation3], 4294967280 }
   0xe   :  { %23 = sfence }
   0xf   :  { %v30_v0 = vlaneseq  ;;  %s45_s14 = sld [smem:[#allocation2]]  ;;  %s358_s15 = sld [smem:[#allocation2 + $0x1]] }
  0x11   :  { %v31_v1 = vshrl.u32 %v30_v0, 7  ;;  %v33_v2 = vand.u32 127, %v30_v0 }
  0x13   :  { %v34_v3 = vadd.s32 128, %v33_v2  ;;  %v35_v4 = vadd.s32 256, %v33_v2  ;;  %v36_v5 = vadd.s32 384, %v33_v2  ;;  %v40_v6 = vmul.u32 512, %v31_v1 }
  0x15   :  { %s46_s0 = smul.u32 2246822507, %s45_s14  ;;  %v41_v7 = vadd.s32 %v40_v6, %v33_v2  ;;  %v42_v8 = vadd.s32 %v40_v6, %v34_v3  ;;  %v43_v9 = vadd.s32 %v40_v6, %v35_v4  ;;  %v44_v10 = vadd.s32 %v40_v6, %v36_v5 }
  0x16   :  { %s48_s16 = smul.u32 3266489909, %s358_s15 }
  0x18   :  { %s49_s17 = sadd.s32 %s48_s16, %s46_s0 }
  0x19   :  { %v50_v11 = vstv %s49_s17 }
  0x1a   :  { %v51_v12 = vxor.u32 %v50_v11, %v41_v7  ;;  %v52_v13 = vxor.u32 %v50_v11, %v42_v8  ;;  %v53_v14 = vxor.u32 %v50_v11, %v43_v9  ;;  %v54_v15 = vxor.u32 %v50_v11, %v44_v10 }
  0x1c   :  { %v359_v16 = vshrl.u32 %v51_v12, 16  ;;  %v360_v17 = vshrl.u32 %v52_v13, 16  ;;  %v361_v18 = vshrl.u32 %v53_v14, 16  ;;  %v362_v19 = vshrl.u32 %v54_v15, 16 }
  0x1e   :  { %v63_v20 = vxor.u32 %v359_v16, %v51_v12  ;;  %v64_v21 = vxor.u32 %v360_v17, %v52_v13  ;;  %v65_v22 = vxor.u32 %v361_v18, %v53_v14  ;;  %v66_v23 = vxor.u32 %v362_v19, %v54_v15 }
  0x20   :  { %v67_v24 = vmul.u32 2146121005, %v63_v20  ;;  %v68_v25 = vmul.u32 2146121005, %v64_v21 }
  0x21   :  { %v69_v26 = vmul.u32 2146121005, %v65_v22  ;;  %v70_v27 = vmul.u32 2146121005, %v66_v23 }
  0x22   :  { %v363_v28 = vshrl.u32 %v67_v24, 15  ;;  %v364_v29 = vshrl.u32 %v68_v25, 15 }
  0x23   :  { %v365_v30 = vshrl.u32 %v69_v26, 15  ;;  %v366_v31 = vshrl.u32 %v70_v27, 15 }
  0x24   :  { %v79_v32 = vxor.u32 %v363_v28, %v67_v24  ;;  %v80_v33 = vxor.u32 %v364_v29, %v68_v25 }
  0x25   :  { %v81_v34 = vxor.u32 %v365_v30, %v69_v26  ;;  %v82_v35 = vxor.u32 %v366_v31, %v70_v27 }
  0x26   :  { %v83_v36 = vmul.u32 2221713035, %v79_v32  ;;  %v84_v37 = vmul.u32 2221713035, %v80_v33 }
  0x27   :  { %v85_v38 = vmul.u32 2221713035, %v81_v34  ;;  %v86_v39 = vmul.u32 2221713035, %v82_v35 }
  0x28   :  { %v367_v40 = vshrl.u32 %v83_v36, 16  ;;  %v368_v41 = vshrl.u32 %v84_v37, 16 }
  0x29   :  { %v369_v42 = vshrl.u32 %v85_v38, 16  ;;  %v370_v43 = vshrl.u32 %v86_v39, 16 }
  0x2a   :  { %v455_v44 = vxor.u32 %v367_v40, %v83_v36  ;;  %v457_v45 = vxor.u32 %v368_v41, %v84_v37 }
  0x2b   :  { %v459_v46 = vxor.u32 %v369_v42, %v85_v38  ;;  %v461_v47 = vxor.u32 %v370_v43, %v86_v39 }
  0x2c   :  { %v99_v48 = vxor.u32 138502176, %v455_v44  ;;  %v100_v49 = vxor.u32 138502176, %v457_v45  ;;  %v147_v50 = vxor.u32 2792937945, %v455_v44 }
  0x2d   :  { %v101_v51 = vxor.u32 138502176, %v459_v46  ;;  %v102_v52 = vxor.u32 138502176, %v461_v47  ;;  %v148_v53 = vxor.u32 2792937945, %v457_v45 }
  0x2e   :  { %v371_v54 = vshrl.u32 %v99_v48, 16  ;;  %v372_v55 = vshrl.u32 %v100_v49, 16  ;;  %v149_v56 = vxor.u32 2792937945, %v459_v46  ;;  %v150_v57 = vxor.u32 2792937945, %v461_v47 }
  0x2f   :  { %v373_v58 = vshrl.u32 %v101_v51, 16  ;;  %v374_v59 = vshrl.u32 %v102_v52, 16  ;;  %v383_v60 = vshrl.u32 %v147_v50, 16  ;;  %v384_v61 = vshrl.u32 %v148_v53, 16 }
  0x30   :  { %v111_v62 = vxor.u32 %v371_v54, %v99_v48  ;;  %v112_v63 = vxor.u32 %v372_v55, %v100_v49  ;;  %v385_v0 = vshrl.u32 %v149_v56, 16  ;;  %v386_v1 = vshrl.u32 %v150_v57, 16 }
  0x31   :  { %v113_v2 = vxor.u32 %v373_v58, %v101_v51  ;;  %v114_v3 = vxor.u32 %v374_v59, %v102_v52  ;;  %v159_v4 = vxor.u32 %v383_v60, %v147_v50  ;;  %v160_v5 = vxor.u32 %v384_v61, %v148_v53 }
  0x32   :  { %v115_v6 = vmul.u32 2146121005, %v111_v62  ;;  %v116_v7 = vmul.u32 2146121005, %v112_v63  ;;  %v161_v8 = vxor.u32 %v385_v0, %v149_v56  ;;  %v162_v9 = vxor.u32 %v386_v1, %v150_v57 }
  0x33   :  { %v117_v10 = vmul.u32 2146121005, %v113_v2  ;;  %v118_v11 = vmul.u32 2146121005, %v114_v3  ;;  %v199_v12 = vxor.u32 1152406418, %v455_v44 }
  0x34   :  { %v375_v13 = vshrl.u32 %v115_v6, 15  ;;  %v376_v14 = vshrl.u32 %v116_v7, 15  ;;  %v163_v15 = vmul.u32 2146121005, %v159_v4  ;;  %v164_v16 = vmul.u32 2146121005, %v160_v5 }
  0x35   :  { %v377_v17 = vshrl.u32 %v117_v10, 15  ;;  %v378_v18 = vshrl.u32 %v118_v11, 15  ;;  %v165_v19 = vmul.u32 2146121005, %v161_v8  ;;  %v166_v20 = vmul.u32 2146121005, %v162_v9 }
  0x36   :  { %v127_v21 = vxor.u32 %v375_v13, %v115_v6  ;;  %v128_v22 = vxor.u32 %v376_v14, %v116_v7  ;;  %v387_v23 = vshrl.u32 %v163_v15, 15  ;;  %v388_v24 = vshrl.u32 %v164_v16, 15 }
  0x37   :  { %v129_v25 = vxor.u32 %v377_v17, %v117_v10  ;;  %v130_v26 = vxor.u32 %v378_v18, %v118_v11  ;;  %v389_v27 = vshrl.u32 %v165_v19, 15  ;;  %v390_v28 = vshrl.u32 %v166_v20, 15 }
  0x38   :  { %v131_v29 = vmul.u32 2221713035, %v127_v21  ;;  %v132_v30 = vmul.u32 2221713035, %v128_v22  ;;  %v175_v31 = vxor.u32 %v387_v23, %v163_v15  ;;  %v176_v32 = vxor.u32 %v388_v24, %v164_v16 }
  0x39   :  { %v133_v33 = vmul.u32 2221713035, %v129_v25  ;;  %v134_v34 = vmul.u32 2221713035, %v130_v26  ;;  %v177_v35 = vxor.u32 %v389_v27, %v165_v19  ;;  %v178_v36 = vxor.u32 %v390_v28, %v166_v20 }
  0x3a   :  { %v379_v37 = vshrl.u32 %v131_v29, 16  ;;  %v380_v38 = vshrl.u32 %v132_v30, 16  ;;  %v179_v39 = vmul.u32 2221713035, %v175_v31  ;;  %v180_v40 = vmul.u32 2221713035, %v176_v32 }
  0x3b   :  { %v381_v41 = vshrl.u32 %v133_v33, 16  ;;  %v382_v42 = vshrl.u32 %v134_v34, 16  ;;  %v181_v43 = vmul.u32 2221713035, %v177_v35  ;;  %v182_v48 = vmul.u32 2221713035, %v178_v36 }
  0x3c   :  { %v143_v49 = vxor.u32 %v379_v37, %v131_v29  ;;  %v391_v50 = vshrl.u32 %v179_v39, 16  ;;  %v392_v51 = vshrl.u32 %v180_v40, 16  ;;  %v144_v52 = vxor.u32 %v380_v38, %v132_v30 }
  0x3d   :  { %v145_v53 = vxor.u32 %v381_v41, %v133_v33  ;;  %v393_v54 = vshrl.u32 %v181_v43, 16  ;;  %v394_v55 = vshrl.u32 %v182_v48, 16  ;;  %v200_v58 = vxor.u32 1152406418, %v457_v45 }
  0x3e   :  { %v191_v56 = vxor.u32 %v391_v50, %v179_v39  ;;  %v192_v57 = vxor.u32 %v392_v51, %v180_v40  ;;  %v201_v59 = vxor.u32 1152406418, %v459_v46  ;;  %v146_v60 = vxor.u32 %v382_v42, %v134_v34 }
  0x3f   :  { %v193_v61 = vxor.u32 %v393_v54, %v181_v43  ;;  %v202_v62 = vxor.u32 1152406418, %v461_v47  ;;  %v395_v63 = vshrl.u32 %v199_v12, 16  ;;  %v194_v0 = vxor.u32 %v394_v55, %v182_v48 }
  0x40   :  { %v475_v1 = vand.u32 %v191_v56, %v143_v49  ;;  %v396_v2 = vshrl.u32 %v200_v58, 16  ;;  %v397_v3 = vshrl.u32 %v201_v59, 16  ;;  %v477_v4 = vand.u32 %v192_v57, %v144_v52 }
  0x41   :  { %v479_v5 = vand.u32 %v193_v61, %v145_v53  ;;  %v398_v6 = vshrl.u32 %v202_v62, 16  ;;  %v211_v7 = vxor.u32 %v395_v63, %v199_v12  ;;  %v267_v10 = vxor.u32 3806842187, %v455_v44 }
  0x42   :  { %v212_v8 = vxor.u32 %v396_v2, %v200_v58  ;;  %v213_v9 = vxor.u32 %v397_v3, %v201_v59  ;;  %v268_v11 = vxor.u32 3806842187, %v457_v45  ;;  %v269_v15 = vxor.u32 3806842187, %v459_v46 }
  0x43   :  { %v214_v13 = vxor.u32 %v398_v6, %v202_v62  ;;  %v215_v14 = vmul.u32 2146121005, %v211_v7  ;;  %v270_v16 = vxor.u32 3806842187, %v461_v47  ;;  %v407_v19 = vshrl.u32 %v267_v10, 16 }
  0x44   :  { %v216_v17 = vmul.u32 2146121005, %v212_v8  ;;  %v217_v18 = vmul.u32 2146121005, %v213_v9  ;;  %v408_v20 = vshrl.u32 %v268_v11, 16  ;;  %v409_v23 = vshrl.u32 %v269_v15, 16 }
  0x45   :  { %v218_v21 = vmul.u32 2146121005, %v214_v13  ;;  %v399_v22 = vshrl.u32 %v215_v14, 15  ;;  %v410_v12 = vshrl.u32 %v270_v16, 16  ;;  %v279_v26 = vxor.u32 %v407_v19, %v267_v10 }
  0x46   :  { %v400_v24 = vshrl.u32 %v216_v17, 15  ;;  %v401_v25 = vshrl.u32 %v217_v18, 15  ;;  %v280_v44 = vxor.u32 %v408_v20, %v268_v11  ;;  %v281_v28 = vxor.u32 %v409_v23, %v269_v15 }
  0x47   :  { %v402_v27 = vshrl.u32 %v218_v21, 15  ;;  %v227_v45 = vxor.u32 %v399_v22, %v215_v14  ;;  %v282_v29 = vxor.u32 %v410_v12, %v270_v16  ;;  %v283_v31 = vmul.u32 2146121005, %v279_v26 }
  0x48   :  { %v228_v30 = vxor.u32 %v400_v24, %v216_v17  ;;  %v229_v46 = vxor.u32 %v401_v25, %v217_v18  ;;  %v284_v47 = vmul.u32 2146121005, %v280_v44  ;;  %v485_v32 = vand.u32 %v194_v0, %v146_v60  ;;  %v24_v44 = vld [vmem:[%s508_s1] sm:$0xff] }
  0x49   :  { %v230_v33 = vxor.u32 %v402_v27, %v218_v21  ;;  %v231_v34 = vmul.u32 2221713035, %v227_v45  ;;  %v285_v35 = vmul.u32 2146121005, %v281_v28  ;;  %v411_v38 = vshrl.u32 %v283_v31, 15 }
  0x4a   :  { %v232_v36 = vmul.u32 2221713035, %v228_v30  ;;  %v233_v37 = vmul.u32 2221713035, %v229_v46  ;;  %v412_v39 = vshrl.u32 %v284_v47, 15 }
  0x4b   :  { %v234_v40 = vmul.u32 2221713035, %v230_v33  ;;  %v403_v41 = vshrl.u32 %v231_v34, 16  ;;  %v286_v42 = vmul.u32 2146121005, %v282_v29  ;;  %v413_v43 = vshrl.u32 %v285_v35, 15 }
  0x4c   :  { %v404_v48 = vshrl.u32 %v232_v36, 16  ;;  %v405_v49 = vshrl.u32 %v233_v37, 16  ;;  %v295_v50 = vxor.u32 %v411_v38, %v283_v31  ;;  %v296_v51 = vxor.u32 %v412_v39, %v284_v47 }
  0x4d   :  { %v406_v52 = vshrl.u32 %v234_v40, 16  ;;  %v243_v53 = vxor.u32 %v403_v41, %v231_v34  ;;  %v414_v54 = vshrl.u32 %v286_v42, 15  ;;  %v297_v55 = vxor.u32 %v413_v43, %v285_v35  ;;  %v25_v35 = vld [vmem:[%s508_s1 + $0x8] sm:$0xff] }
  0x4e   :  { %v244_v56 = vxor.u32 %v404_v48, %v232_v36  ;;  %v245_v57 = vxor.u32 %v405_v49, %v233_v37  ;;  %v299_v58 = vmul.u32 2221713035, %v295_v50  ;;  %v300_v59 = vmul.u32 2221713035, %v296_v51 }
  0x4f   :  { %v246_v60 = vxor.u32 %v406_v52, %v234_v40  ;;  %v247_v61 = vand.u32 %v243_v53, %v475_v1  ;;  %v251_v62 = vshll.u32 %v243_v53, 9  ;;  %v259_v63 = vshll.u32 %v243_v53, 18 }
  0x50   :  { %v248_v0 = vand.u32 %v244_v56, %v477_v4  ;;  %v249_v2 = vand.u32 %v245_v57, %v479_v5  ;;  %v252_v3 = vshll.u32 %v244_v56, 9  ;;  %v253_v6 = vshll.u32 %v245_v57, 9 }
  0x51   :  { %v250_v7 = vand.u32 %v246_v60, %v485_v32  ;;  %v254_v8 = vshll.u32 %v246_v60, 9  ;;  %v255_v9 = vand.u32 %v251_v62, %v247_v61  ;;  %v260_v10 = vshll.u32 %v244_v56, 18 }
  0x52   :  { %v256_v11 = vand.u32 %v252_v3, %v248_v0  ;;  %v257_v13 = vand.u32 %v253_v6, %v249_v2  ;;  %v261_v14 = vshll.u32 %v245_v57, 18  ;;  %v262_v16 = vshll.u32 %v246_v60, 18 }
  0x53   :  { %v258_v15 = vand.u32 %v254_v8, %v250_v7  ;;  %v298_v17 = vxor.u32 %v414_v54, %v286_v42  ;;  %v301_v18 = vmul.u32 2221713035, %v297_v55  ;;  %v263_v19 = vand.u32 %v259_v63, %v255_v9 }
  0x54   :  { %v264_v20 = vand.u32 %v260_v10, %v256_v11  ;;  %v415_v21 = vshrl.u32 %v299_v58, 16  ;;  %v416_v22 = vshrl.u32 %v300_v59, 16  ;;  %v265_v23 = vand.u32 %v261_v14, %v257_v13 }
  0x55   :  { %v302_v12 = vmul.u32 2221713035, %v298_v17  ;;  %v417_v24 = vshrl.u32 %v301_v18, 16  ;;  %v266_v27 = vand.u32 %v262_v16, %v258_v15  ;;  %v323_v46 = vand.u32 8388607, %v475_v1 }
  0x56   :  { %v311_v25 = vxor.u32 %v415_v21, %v299_v58  ;;  %v312_v26 = vxor.u32 %v416_v22, %v300_v59  ;;  %v324_v31 = vand.u32 8388607, %v477_v4  ;;  %v325_v34 = vand.u32 8388607, %v479_v5 }
  0x57   :  { %v418_v45 = vshrl.u32 %v302_v12, 16  ;;  %v313_v28 = vxor.u32 %v417_v24, %v301_v18  ;;  %v28_v36 = vcombine.high %v24_v44, %v24_v44  ;;  %v326_v41 = vand.u32 8388607, %v485_v32 }
  0x58   :  { %v315_v29 = vand.u32 %v311_v25, %v263_v19  ;;  %v316_v30 = vand.u32 %v312_v26, %v264_v20  ;;  %v29_v1 = vcombine.high %v25_v35, %v25_v35 }
  0x59   :  { %v314_v47 = vxor.u32 %v418_v45, %v302_v12  ;;  %v317_v33 = vand.u32 %v313_v28, %v265_v23 }
  0x5a   :  { %v319_v37 = vand.u32 4286578688, %v315_v29  ;;  %v320_v38 = vand.u32 4286578688, %v316_v30 }
  0x5b   :  { %v318_v39 = vand.u32 %v314_v47, %v266_v27  ;;  %v321_v40 = vand.u32 4286578688, %v317_v33 }
  0x5c   :  { %v327_v42 = vor.u32 %v323_v46, %v319_v37  ;;  %v328_v43 = vor.u32 %v324_v31, %v320_v38 }
  0x5d   :  { %v322_v48 = vand.u32 4286578688, %v318_v39  ;;  %v329_v4 = vor.u32 %v325_v34, %v321_v40 }
  0x5e   :  { %v331_v49 = vxor.u32 %v327_v42, %v24_v44  ;;  %v332_v50 = vxor.u32 %v328_v43, %v28_v36 }
  0x5f   :  { %v330_v51 = vor.u32 %v326_v41, %v322_v48  ;;  %v333_v5 = vxor.u32 %v329_v4, %v25_v35 }
  0x60   :  { %v335_v52 = vand.u32 2147483647, %v331_v49  ;;  %v336_v53 = vand.u32 2147483647, %v332_v50 }
  0x61   :  { %v334_v54 = vxor.u32 %v330_v51, %v29_v1  ;;  %v337_v55 = vand.u32 2147483647, %v333_v5 }
  0x62   :  { %vm339_vm0 = vcmp.lt.s32.totalorder %v335_v52, 1120403456  ;;  %vm340_vm1 = vcmp.lt.s32.totalorder %v336_v53, 1120403456 }
  0x63   :  { %v338_v56 = vand.u32 2147483647, %v334_v54  ;;  %vm341_vm2 = vcmp.lt.s32.totalorder %v337_v55, 1120403456  ;;  %v343_v57 = vsel %vm339_vm0, %v331_v49, 0  ;;  %v344_v58 = vsel %vm340_vm1, %v332_v50, 0 }
  0x64   :  { %v345_v32 = vsel %vm341_vm2, %v333_v5, 0  ;;  %v347_v59 = vcombine.low %v343_v57, %v344_v58 }
  0x65   :  { %vm342_vm3 = vcmp.lt.s32.totalorder %v338_v56, 1120403456 }
  0x66   :  { %v346_v60 = vsel %vm342_vm3, %v334_v54, 0  ;;  %351 = vst [vmem:[%s509_s2] sm:$0xff] %v347_v59 }
  0x67   :  { %v348_v61 = vcombine.low %v345_v32, %v346_v60 }
  0x69   :  { %352 = vst [vmem:[%s509_s2 + $0x8] sm:$0xff] %v348_v61 }
  0x6a   :  { %357 = vsyncpa [#allocation3], 1 }

</bundles_post_ra>
